<compile_context>
chip_gen: v7x
topology: tpu7x:2x2x1
jax: 0.10.0
libtpu: 0.0.40
codegen_flags: <defaults>
</compile_context>

<pallas_src>
import functools

import jax
import jax.numpy as jnp
from jax.experimental import pallas as pl
from jax.experimental.pallas import tpu as pltpu

GAMMA = 4   # module default
EPS = 1e-10


def _focal_loss_partial_kernel(x_ref, t_ref, p_ref, *, tile_rows, batch, need_mask):
    x = x_ref[...].astype(jnp.float32)
    t = t_ref[...].astype(jnp.float32)

    s = jax.nn.sigmoid(x)          # sigmoid_inputs
    one_m_s = 1.0 - s

    # (1 - s)**4 and s**4 via mul chains (integer gamma=4) on the VPU.
    q = one_m_s * one_m_s
    one_m_s_g = q * q
    r = s * s
    s_g = r * r

    # Fold the *2 positive-class weight into the target factor (t + t).
    two_t = t + t
    loss = -(two_t * one_m_s_g * jnp.log(s + EPS)
             + (1.0 - t) * s_g * jnp.log(one_m_s + EPS))

    if need_mask:
        # Zero out rows past the real batch (last, padded tile).  jnp.where
        # is a select, so garbage/NaN in padded rows cannot leak through.
        i = pl.program_id(0)
        rows = i * tile_rows + jax.lax.broadcasted_iota(jnp.int32, loss.shape, 0)
        loss = jnp.where(rows < batch, loss, 0.0)

    c = loss.shape[-1]
    # vreg-friendly partial reduce: fold row-groups of 8 with pure VPU adds
    # (no per-step cross-lane XLU reduce); final scalar reduce is in wrapper.
    p_ref[...] = loss.reshape(tile_rows // 8, 8, c).sum(axis=0)


def multi_label_focal_loss(inputs, targets, *, tile_rows=None,
                           target_tile_bytes=2 << 20):
    """Mean focal loss over all elements, matching the PyTorch module."""
    assert inputs.shape == targets.shape
    B, C = inputs.shape

    # Binary targets are exact in bf16 -> 25% less HBM read traffic.
    if targets.dtype == jnp.float32:
        targets = targets.astype(jnp.bfloat16)

    if tile_rows is None:
        # ~2 MiB of f32 inputs per tile; never more rows than (padded) batch.
        tr = max(8, (target_tile_bytes // (4 * C)) // 8 * 8)
        b_round = ((B + 7) // 8) * 8
        tile_rows = min(tr, b_round)
    assert tile_rows % 8 == 0, "tile_rows must be a multiple of 8"

    num_tiles = pl.cdiv(B, tile_rows)
    need_mask = (B % tile_rows) != 0

    kernel = functools.partial(
        _focal_loss_partial_kernel,
        tile_rows=tile_rows, batch=B, need_mask=need_mask,
    )

    # Explicit scoped-VMEM limit sized to the double-buffered tiles + headroom
    # (stays well under v7x's 64 MiB physical VMEM).
    x_bytes = tile_rows * C * inputs.dtype.itemsize
    t_bytes = tile_rows * C * targets.dtype.itemsize
    vmem_limit = int(min(48 << 20, max(16 << 20, 2 * (x_bytes + t_bytes) + (4 << 20))))

    partials = pl.pallas_call(
        kernel,
        out_shape=jax.ShapeDtypeStruct((num_tiles, 8, C), jnp.float32),
        grid_spec=pltpu.PrefetchScalarGridSpec(
            num_scalar_prefetch=0,
            grid=(num_tiles,),
            in_specs=[
                pl.BlockSpec((tile_rows, C), lambda i: (i, 0)),
                pl.BlockSpec((tile_rows, C), lambda i: (i, 0)),
            ],
            out_specs=pl.BlockSpec((None, 8, C), lambda i: (i, 0, 0)),
        ),
        compiler_params=pltpu.CompilerParams(
            dimension_semantics=("parallel",),   # independent tiles -> both TCs on v7x
            vmem_limit_bytes=vmem_limit,
        ),
    )(inputs, targets)

    # Tiny final reduce + mean in plain JAX.
    return jnp.sum(partials) / jnp.float32(B * C)


def _reference(inputs, targets):
    s = jax.nn.sigmoid(inputs)
    pos = -targets * (1 - s) ** GAMMA * jnp.log(s + EPS) * 2
    neg = -(1 - targets) * s ** GAMMA * jnp.log(1 - s + EPS)
    return jnp.mean(pos + neg)


if __name__ == "__main__":
    key = jax.random.PRNGKey(0)

    # (B, C): one tile-aligned case and one ragged case (exercises the mask).
    for B, C in [(16, 128), (12, 128)]:
        k1, k2 = jax.random.split(jax.random.fold_in(key, B * 1000 + C))
        inputs = jax.random.normal(k1, (B, C), dtype=jnp.float32) * 3.0
        targets = (jax.random.uniform(k2, (B, C)) < 0.3).astype(jnp.float32)

        out = jax.block_until_ready(multi_label_focal_loss(inputs, targets))
        ref = _reference(inputs, targets)
        assert jnp.allclose(out, ref, rtol=1e-5, atol=1e-6), (B, C, out, ref)

    print("KERNEL_OK")
</pallas_src>

<mosaic_0001>
module attributes {stable_mosaic.version = 11 : i64} {
  func.func @_focal_loss_partial_kernel(%arg0: i32, %arg1: memref<16x128xf32, #tpu.memory_space<vmem>>, %arg2: memref<16x128xbf16, #tpu.memory_space<vmem>>, %arg3: memref<1x8x128xf32, #tpu.memory_space<vmem>>) attributes {dimension_semantics = [#tpu.dimension_semantics<parallel>], iteration_bounds = array<i64: 1>, scalar_prefetch = 0 : i64, scratch_operands = 0 : i64, tpu.core_type = #tpu.core_type<tc>, window_params = [{transform_indices = @transform_0, window_bounds = array<i64: 16, 128>}, {transform_indices = @transform_1, window_bounds = array<i64: 16, 128>}, {transform_indices = @transform_2, window_bounds = array<i64: 1, 8, 128>}]} {
    %c0 = arith.constant 0 : index
    %c0_0 = arith.constant 0 : index
    %0 = vector.load %arg1[%c0, %c0_0] : memref<16x128xf32, #tpu.memory_space<vmem>>, vector<16x128xf32>
    %c0_1 = arith.constant 0 : index
    %c0_2 = arith.constant 0 : index
    %1 = vector.load %arg2[%c0_1, %c0_2] : memref<16x128xbf16, #tpu.memory_space<vmem>>, vector<16x128xbf16>
    %2 = arith.extf %1 : vector<16x128xbf16> to vector<16x128xf32>
    %3 = arith.negf %0 : vector<16x128xf32>
    %4 = math.exp %3 : vector<16x128xf32>
    %cst = arith.constant 1.000000e+00 : f32
    %5 = vector.broadcast %cst : f32 to vector<16x128xf32>
    %6 = arith.addf %5, %4 : vector<16x128xf32>
    %7 = arith.divf %5, %6 : vector<16x128xf32>
    %cst_3 = arith.constant 1.000000e+00 : f32
    %8 = vector.broadcast %cst_3 : f32 to vector<16x128xf32>
    %9 = arith.subf %8, %7 : vector<16x128xf32>
    %10 = arith.mulf %9, %9 : vector<16x128xf32>
    %11 = arith.mulf %10, %10 : vector<16x128xf32>
    %12 = arith.mulf %7, %7 : vector<16x128xf32>
    %13 = arith.mulf %12, %12 : vector<16x128xf32>
    %14 = arith.addf %2, %2 : vector<16x128xf32>
    %15 = arith.mulf %14, %11 : vector<16x128xf32>
    %cst_4 = arith.constant 1.000000e-10 : f32
    %16 = vector.broadcast %cst_4 : f32 to vector<16x128xf32>
    %17 = arith.addf %7, %16 : vector<16x128xf32>
    %18 = math.log %17 : vector<16x128xf32>
    %19 = arith.mulf %15, %18 : vector<16x128xf32>
    %cst_5 = arith.constant 1.000000e+00 : f32
    %20 = vector.broadcast %cst_5 : f32 to vector<16x128xf32>
    %21 = arith.subf %20, %2 : vector<16x128xf32>
    %22 = arith.mulf %21, %13 : vector<16x128xf32>
    %cst_6 = arith.constant 1.000000e-10 : f32
    %23 = vector.broadcast %cst_6 : f32 to vector<16x128xf32>
    %24 = arith.addf %9, %23 : vector<16x128xf32>
    %25 = math.log %24 : vector<16x128xf32>
    %26 = arith.mulf %22, %25 : vector<16x128xf32>
    %27 = arith.addf %19, %26 : vector<16x128xf32>
    %cst_7 = arith.constant 0.000000e+00 : f32
    %28 = vector.broadcast %cst_7 : f32 to vector<16x128xf32>
    %29 = arith.subf %28, %27 : vector<16x128xf32>
    %30 = vector.shape_cast %29 : vector<16x128xf32> to vector<2x8x128xf32>
    %cst_8 = arith.constant dense<0.000000e+00> : vector<8x128xf32>
    %31 = vector.multi_reduction <add>, %30, %cst_8 [0] : vector<2x8x128xf32> to vector<8x128xf32>
    %c0_9 = arith.constant 0 : index
    %c0_10 = arith.constant 0 : index
    %c0_11 = arith.constant 0 : index
    %32 = vector.load %arg3[%c0_9, %c0_10, %c0_11] : memref<1x8x128xf32, #tpu.memory_space<vmem>>, vector<1x8x128xf32>
    %33 = vector.shape_cast %32 : vector<1x8x128xf32> to vector<8x128xf32>
    %34 = vector.shape_cast %31 : vector<8x128xf32> to vector<1x8x128xf32>
    tpu.vector_store %arg3[%c0_9, %c0_10, %c0_11], %34 {strides = array<i32>} : memref<1x8x128xf32, #tpu.memory_space<vmem>>, vector<1x8x128xf32>,
    return
  }
  func.func @transform_0(%arg0: i32) -> (i32, i32) {
    %c0_i32 = arith.constant 0 : i32
    %c0_i32_0 = arith.constant 0 : i32
    return %arg0, %c0_i32 : i32, i32
  }
  func.func @transform_1(%arg0: i32) -> (i32, i32) {
    %c0_i32 = arith.constant 0 : i32
    %c0_i32_0 = arith.constant 0 : i32
    return %arg0, %c0_i32 : i32, i32
  }
  func.func @transform_2(%arg0: i32) -> (i32, i32, i32) {
    %c0_i32 = arith.constant 0 : i32
    %c0_i32_0 = arith.constant 0 : i32
    %c0_i32_1 = arith.constant 0 : i32
    return %arg0, %c0_i32, %c0_i32_0 : i32, i32, i32
  }
}

</mosaic_0001>

<bundles_post_ra>
// kernel: tpu_custom_call.1
= control target key start
LH: loop header
LB: loop body
LE: loop exit
PB: predicated region body
PF: predicated region fallthrough
CT: control target
= control target key end

     0   :  { %7 = vsyncpa [#allocation3], 0  ;;  %s273_s0 = inlined_call_operand.hbm [shape: f32[16,128], index: 0, kind: input, shape index: {}]   ;;  %s274_s1 = inlined_call_operand.hbm [shape: bf16[16,128], index: 1, kind: input, shape index: {}]   ;;  %s275_s2 = inlined_call_operand.hbm [shape: f32[1,8,128], index: 2, kind: output, shape index: {}]  }
   0x1   :  { %8 = vsyncpa [#allocation6], 0 }
   0x2   :  { %9 = vsyncpa [#allocation4], 0  ;;  %s215_s9 = smov [#allocation2]   ;;  %s143_s13 = scalar_lea.hbm %s273_s0, 256 }
   0x3   :  { %s15_s10 = sshll.u32 %s215_s9, 4  ;;  %p144_p0 = scmp.ne.s32.totalorder %s273_s0, %s143_s13  ;;  %s16_s10 = int_to_ptr.vmem [resolvable:$true] %s15_s10 }
   0x4   :  { %p147_p1 = scmp.lt.u32.totalorder %s143_s13, %s273_s0 }
   0x6   :  { %p149_p2 = pnand %p147_p1, %p144_p0 }
   0x8   :  { %152 = shalt.err (!%p149_p2)
}
   0x9   :  { %s153_s18 = scalar_lea.vmem %s16_s10, 256  ;;  %p158_p4 = scmp.lt.s32.totalorder %s16_s10, %s16_s10 }
   0xa   :  { %p154_p3 = scmp.ne.s32.totalorder %s16_s10, %s153_s18  ;;  %p159_p5 = scmp.lt.s32.totalorder %s153_s18, %s153_s18 }
   0xc   :  { %p160_p6 = por %p159_p5, %p158_p4 }
   0xe   :  { %p161_p7 = pnand %p160_p6, %p154_p3 }
  0x10   :  { %164 = shalt.err (!%p161_p7)
}
  0x11   :  { %s216_s19 = smov 128   ;;  %s217_s20 = smov 8  }
  0x12   :  { %21 = dma.hbm_to_vmem [thread:$0]  %s273_s0, 256, %s16_s10, [#allocation3], %s216_s19, %s216_s19, %s217_s20  }
  0x13   :  { %s218_s23 = smov [#allocation5]   ;;  %s165_s27 = scalar_lea.hbm %s274_s1, 128 }
  0x14   :  { %s27_s24 = sshll.u32 %s218_s23, 4  ;;  %p166_p8 = scmp.ne.s32.totalorder %s274_s1, %s165_s27  ;;  %s28_s24 = int_to_ptr.vmem [resolvable:$true] %s27_s24 }
  0x15   :  { %p169_p9 = scmp.lt.u32.totalorder %s165_s27, %s274_s1 }
  0x17   :  { %p171_p10 = pnand %p169_p9, %p166_p8 }
  0x19   :  { %174 = shalt.err (!%p171_p10)
}
  0x1a   :  { %s175_s4 = scalar_lea.vmem %s28_s24, 128  ;;  %p180_p12 = scmp.lt.s32.totalorder %s28_s24, %s28_s24 }
  0x1b   :  { %p176_p11 = scmp.ne.s32.totalorder %s28_s24, %s175_s4  ;;  %p181_p13 = scmp.lt.s32.totalorder %s175_s4, %s175_s4 }
  0x1d   :  { %p182_p0 = por %p181_p13, %p180_p12 }
  0x1f   :  { %p183_p1 = pnand %p182_p0, %p176_p11 }
  0x21   :  { %186 = shalt.err (!%p183_p1)
}
  0x22   :  { %s219_s0 = smov 64   ;;  %s220_s5 = smov 4  }
  0x23   :  { %33 = dma.hbm_to_vmem [thread:$0]  %s274_s1, 128, %s28_s24, [#allocation6], %s219_s0, %s219_s0, %s220_s5  }
  0x24   :  { %209 = dma.done.wait [#allocation3], 256  }
  0x25   :  { %210 = vsyncadd [#allocation3], 4294967040 }
  0x26   :  { %211 = dma.done.wait [#allocation6], 128  }
  0x27   :  { %212 = vsyncadd [#allocation6], 4294967168  ;;  %v40_v0 = vld [vmem:[#allocation2] sm:$0xff]  ;;  %v41_v1 = vld [vmem:[#allocation2 + $0x8] sm:$0xff]  ;;  %s221_s1 = smov [#allocation7]  }
  0x28   :  { %v114_v2 = vmul.f32 -1.442695, %v40_v0  ;;  %v115_v3 = vmul.f32 -1.442695, %v41_v1  ;;  %v117_v10 = vld [vmem:[#allocation5] sm:$0xff]   ;;  %s104_s8 = sshll.u32 %s221_s1, 4  ;;  %s105_s8 = int_to_ptr.vmem [resolvable:$true] %s104_s8 }
  0x29   :  { %v118_v16 = vunpack.c.l.bf16 %v117_v10  ;;  %v119_v19 = vunpack.c.h.bf16 %v117_v10  ;;  %s187_s9 = scalar_lea.vmem %s105_s8, 128  ;;  %p192_p3 = scmp.lt.s32.totalorder %s105_s8, %s105_s8 }
  0x2a   :  { %127 = vpow2.f32 %v114_v2  ;;  %p188_p2 = scmp.ne.s32.totalorder %s105_s8, %s187_s9  ;;  %p193_p4 = scmp.lt.s32.totalorder %s187_s9, %s187_s9 }
  0x2b   :  { %129 = vpow2.f32 %v115_v3  ;;  %v68_v24 = vadd.f32 %v118_v16, %v118_v16  ;;  %v69_v26 = vadd.f32 %v119_v19, %v119_v19  ;;  %v80_v28 = vsub.f32 1.0, %v118_v16 }
  0x2c   :  { %v81_v30 = vsub.f32 1.0, %v119_v19  ;;  %p194_p5 = por %p193_p4, %p192_p3 }
  0x2e   :  { %p195_p6 = pnand %p194_p5, %p188_p2 }
  0x34   :  { %v128_v4 = vpop.eup %127 }
  0x35   :  { %v130_v5 = vpop.eup %129  ;;  %v52_v6 = vadd.f32 1.0, %v128_v4 }
  0x36   :  { %v53_v7 = vadd.f32 1.0, %v130_v5 }
  0x37   :  { %131 = vrcp.f32 %v52_v6 }
  0x38   :  { %133 = vrcp.f32 %v53_v7 }
  0x41   :  { %v132_v8 = vpop.eup %131 }
  0x42   :  { %v134_v9 = vpop.eup %133  ;;  %v58_v11 = vsub.f32 1.0, %v132_v8  ;;  %v72_v12 = vadd.f32 1e-10, %v132_v8  ;;  %v64_v21 = vmul.f32 %v132_v8, %v132_v8 }
  0x43   :  { %v59_v13 = vsub.f32 1.0, %v134_v9  ;;  %v73_v14 = vadd.f32 1e-10, %v134_v9  ;;  %v65_v22 = vmul.f32 %v134_v9, %v134_v9 }
  0x44   :  { %135 = vlog2.f32 %v72_v12  ;;  %v84_v15 = vadd.f32 1e-10, %v58_v11  ;;  %v60_v17 = vmul.f32 %v58_v11, %v58_v11  ;;  %v66_v27 = vmul.f32 %v64_v21, %v64_v21 }
  0x45   :  { %137 = vlog2.f32 %v73_v14  ;;  %v85_v18 = vadd.f32 1e-10, %v59_v13  ;;  %v61_v20 = vmul.f32 %v59_v13, %v59_v13  ;;  %v67_v29 = vmul.f32 %v65_v22, %v65_v22 }
  0x46   :  { %139 = vlog2.f32 %v84_v15  ;;  %v62_v23 = vmul.f32 %v60_v17, %v60_v17  ;;  %v82_v36 = vmul.f32 %v80_v28, %v66_v27 }
  0x47   :  { %141 = vlog2.f32 %v85_v18  ;;  %v63_v25 = vmul.f32 %v61_v20, %v61_v20  ;;  %v83_v39 = vmul.f32 %v81_v30, %v67_v29 }
  0x48   :  { %v70_v31 = vmul.f32 %v68_v24, %v62_v23 }
  0x49   :  { %v71_v33 = vmul.f32 %v69_v26, %v63_v25 }
  0x4e   :  { %v136_v32 = vpop.eup %135 }
  0x4f   :  { %v138_v34 = vpop.eup %137  ;;  %v75_v35 = vmul.f32 0.6931472, %v136_v32 }
  0x50   :  { %v140_v37 = vpop.eup %139  ;;  %v77_v38 = vmul.f32 0.6931472, %v138_v34 }
  0x51   :  { %v142_v40 = vpop.eup %141  ;;  %v78_v41 = vmul.f32 %v75_v35, %v70_v31  ;;  %v87_v42 = vmul.f32 0.6931472, %v140_v37 }
  0x52   :  { %v79_v43 = vmul.f32 %v77_v38, %v71_v33  ;;  %v89_v44 = vmul.f32 0.6931472, %v142_v40 }
  0x53   :  { %v90_v45 = vmul.f32 %v87_v42, %v82_v36 }
  0x54   :  { %v91_v46 = vmul.f32 %v89_v44, %v83_v39 }
  0x55   :  { %v92_v47 = vadd.f32 %v90_v45, %v78_v41 }
  0x56   :  { %v93_v48 = vadd.f32 %v91_v46, %v79_v43 }
  0x57   :  { %v94_v49 = vsub.f32 0.0, %v92_v47 }
  0x58   :  { %v95_v50 = vsub.f32 0.0, %v93_v48 }
  0x5a   :  { %v96_v51 = vadd.f32 %v95_v50, %v94_v49 }
  0x5c   :  { %97 = vst [vmem:[#allocation7] sm:$0xff] %v96_v51 }
  0x5d   :  { %198 = shalt.err (!%p195_p6)
}
  0x5e   :  { %s199_s12 = scalar_lea.hbm %s275_s2, 128 }
  0x5f   :  { %p200_p7 = scmp.ne.s32.totalorder %s275_s2, %s199_s12  ;;  %p203_p8 = scmp.lt.u32.totalorder %s199_s12, %s275_s2 }
  0x61   :  { %p205_p9 = pnand %p203_p8, %p200_p7 }
  0x63   :  { %208 = shalt.err (!%p205_p9)
}
  0x64   :  { %107 = dma.vmem_to_hbm [thread:$0]  %s105_s8, 128, %s275_s2, [#allocation4]  }
  0x65   :  { %213 = dma.done.wait [#allocation4], 128  }
  0x66   :  { %214 = vsyncadd [#allocation4], 4294967168 }
  0x67   :  { %111 = vsyncpa [#allocation3], 1 }
  0x68   :  { %112 = vsyncpa [#allocation6], 1 }
  0x69   :  { %113 = vsyncpa [#allocation4], 1 }

</bundles_post_ra>
